<compile_context>
chip_gen: v7x
topology: tpu7x:2x2x1
jax: 0.10.0
libtpu: 0.0.40
codegen_flags: <defaults>
</compile_context>

<pallas_src>
import functools
import math

import jax
import jax.numpy as jnp
from jax.experimental import pallas as pl
from jax.experimental.pallas import tpu as pltpu

LANES = 128
SUBLANES = 8


def _round_up(x: int, m: int) -> int:
    return (x + m - 1) // m * m


def _late_fusion_kernel(main_ref, attn_ref, w1_ref, b1_ref, w2_ref, b2_ref,
                        alpha_ref, out_ref, acc_ref, *, thw: int, tr: int,
                        rem: int):
    """Streams one (TR, 128) attn block per step; MLP + blend on the last step.

    main_ref : (1, 1, D)   resident across K for the current batch row
    attn_ref : (1, TR, 128) pipelined (double-buffered) reduction tile
    acc_ref  : (8, 128)    f32 lane/sublane-aligned partial-sum scratch
    out_ref  : (1, 1, D)
    """
    k = pl.program_id(1)
    nk = pl.num_programs(1)

    @pl.when(k == 0)
    def _init():
        acc_ref[...] = jnp.zeros_like(acc_ref)

    def _accumulate(mask_tail: bool):
        tile = attn_ref[0].astype(jnp.float32)                   # (TR, 128)
        if mask_tail:
            # Only the final K block can overrun R; zero its OOB sublanes so
            # the sum stays unbiased (lane padding is already zero-filled in
            # the wrapper).
            row = jax.lax.broadcasted_iota(jnp.int32, tile.shape, 0)
            tile = jnp.where(row < rem, tile, 0.0)
        # Fold TR sublanes into 8: whole-vreg adds on the VPU, no XLU per step.
        part = jnp.sum(tile.reshape(tr // SUBLANES, SUBLANES, LANES), axis=0)
        acc_ref[...] += part

    if rem != 0:
        pl.when(k == nk - 1)(lambda: _accumulate(True))
        pl.when(k != nk - 1)(lambda: _accumulate(False))
    else:
        _accumulate(False)

    @pl.when(k == nk - 1)
    def _finalize():
        # One cross-sublane + one cross-lane reduce per batch row (XLU), then
        # the tiny MLP and the alpha blend -- all off the streaming path.
        total = jnp.sum(acc_ref[...], axis=0, keepdims=True)     # (1, 128)
        total = jnp.sum(total, axis=1, keepdims=True)            # (1, 1)
        attn_feat = total * jnp.float32(1.0 / thw)               # mean

        # Linear(1 -> D): K=1 matmul is a broadcast multiply (VPU).
        h = jnp.maximum(attn_feat * w1_ref[...] + b1_ref[...], 0.0)       # (1, D)
        # Linear(D -> D): tiny MXU matmul, once per batch row.
        proj = jnp.dot(h, w2_ref[...],
                       preferred_element_type=jnp.float32) + b2_ref[...]  # (1, D)

        alpha = alpha_ref[0]
        out_ref[0] = (alpha * main_ref[0].astype(jnp.float32)
                      + (1.0 - alpha) * proj).astype(out_ref.dtype)


def late_fusion_block(main_feat, attn_map, w1, b1, w2, b2, alpha, *,
                      tile_bytes_target: int = 2 << 20):
    """main_feat: (B, D); attn_map: (B, 1, T, H, W) f32 or bf16.

    tile_bytes_target: target attn bytes per grid step (f32 equivalent).
      ~1 MiB is enough to hit roofline on v5e; 2-4 MiB on v6e; >= 4 MiB on v7x.
    """
    B, D = main_feat.shape
    assert attn_map.ndim == 5 and attn_map.shape[0] == B and attn_map.shape[1] == 1, \
        "attn_map must be (B, 1, T, H, W)"

    thw = math.prod(attn_map.shape[1:])

    # Lane/sublane-dense layout: (B, R, 128). Each K step is one contiguous
    # HBM run per batch row and fills full (8, 128) vregs regardless of B.
    R = pl.cdiv(thw, LANES)
    attn_flat = attn_map.reshape(B, thw)
    if thw % LANES != 0:
        # TODO(synk): this pad is a one-time extra HBM copy; producers should
        # emit THW % 128 == 0 (or bf16) to keep the attn stream zero-copy.
        attn_flat = jnp.pad(attn_flat, ((0, 0), (0, R * LANES - thw)))
    attn3 = attn_flat.reshape(B, R, LANES)

    # Reduction tile: TR sublanes x 128 lanes, TR a multiple of 8.
    tr_target = max(SUBLANES,
                    (tile_bytes_target // (LANES * 4)) // SUBLANES * SUBLANES)
    tr = min(tr_target, _round_up(R, SUBLANES))
    nk = pl.cdiv(R, tr)
    rem = R % tr                      # sublanes valid in the final K block (0 = full)

    main3 = main_feat.reshape(B, 1, D)

    # VMEM budget from actual block sizes; cap at 48 MiB (safe on v7x's 64 MiB
    # physical VMEM; v5e/v6e have 128 MiB so this never over-asks).
    itemsize = attn3.dtype.itemsize
    vmem_est = (2 * tr * LANES * itemsize          # attn double buffer
                + 2 * 2 * D * 4                    # main + out blocks (buffered)
                + 2 * (D * D + 3 * D) * 4          # w1/b1/w2/b2
                + SUBLANES * LANES * 4)            # accumulator scratch
    vmem_limit = int(min(max(2 * vmem_est + (2 << 20), 16 << 20), 48 << 20))

    cost = pl.CostEstimate(
        flops=B * R * LANES + 2 * B * D * D + 6 * B * D,
        transcendentals=0,
        bytes_accessed=(B * R * LANES * itemsize
                        + (3 * B * D + D * D + 3 * D) * 4),
    )

    kernel = functools.partial(_late_fusion_kernel, thw=thw, tr=tr, rem=rem)

    out = pl.pallas_call(
        kernel,
        out_shape=jax.ShapeDtypeStruct((B, 1, D), jnp.float32),
        grid=(B, nk),
        in_specs=[
            pl.BlockSpec((1, 1, D), lambda b, k: (b, 0, 0)),        # main_feat
            pl.BlockSpec((1, tr, LANES), lambda b, k: (b, k, 0)),   # attn stream
            pl.BlockSpec((1, D), lambda b, k: (0, 0)),              # w1
            pl.BlockSpec((1, D), lambda b, k: (0, 0)),              # b1
            pl.BlockSpec((D, D), lambda b, k: (0, 0)),              # w2
            pl.BlockSpec((1, D), lambda b, k: (0, 0)),              # b2
            pl.BlockSpec(memory_space=pltpu.MemorySpace.SMEM),      # alpha
        ],
        out_specs=pl.BlockSpec((1, 1, D), lambda b, k: (b, 0, 0)),
        scratch_shapes=[pltpu.VMEM((SUBLANES, LANES), jnp.float32)],
        compiler_params=pltpu.CompilerParams(
            dimension_semantics=("parallel", "arbitrary"),
            vmem_limit_bytes=vmem_limit,
        ),
        cost_estimate=cost,
    )(main3, attn3, w1, b1, w2, b2, alpha)

    return out.reshape(B, D)


def init_params(key, out_dim):
    """Mirror nn.Linear default init (uniform +-1/sqrt(fan_in)).

    Torch weights are stored transposed so the kernel can use x @ W:
      Linear(1, D).weight (D, 1) -> (1, D); Linear(D, D).weight -> (D, D)^T.
    """
    k1, k2, k3, k4 = jax.random.split(key, 4)
    bound1 = 1.0  # 1/sqrt(1)
    w1 = jax.random.uniform(k1, (1, out_dim), jnp.float32, -bound1, bound1)
    b1 = jax.random.uniform(k2, (1, out_dim), jnp.float32, -bound1, bound1)
    bound2 = 1.0 / (out_dim ** 0.5)
    w2 = jax.random.uniform(k3, (out_dim, out_dim), jnp.float32, -bound2, bound2)
    b2 = jax.random.uniform(k4, (1, out_dim), jnp.float32, -bound2, bound2)
    alpha = jnp.array([0.5], dtype=jnp.float32)
    return w1, b1, w2, b2, alpha


if __name__ == "__main__":
    B, out_dim = 2, 32

    key = jax.random.PRNGKey(0)
    k_main, k_attn, k_params = jax.random.split(key, 3)

    main_feat = jax.random.normal(k_main, (B, out_dim), jnp.float32)
    w1, b1, w2, b2, alpha = init_params(k_params, out_dim)

    def ref_fn(mf, am):
        attn_feat = am.mean(axis=(2, 3, 4))                       # (B, 1)
        h = jnp.maximum(attn_feat @ w1 + b1, 0.0)
        proj = h @ w2 + b2
        return alpha[0] * mf + (1.0 - alpha[0]) * proj

    # 1) THW % 128 == 0 and single K step; 2) THW not lane-aligned (wrapper
    # pad + gated tail mask); 3) small tile target to force nk > 1 with a
    # partial last block (multi-step accumulate + gated mask).
    cases = [
        ((B, 1, 8, 16, 16), 2 << 20),   # THW = 2048
        ((B, 1, 7, 15, 16), 2 << 20),   # THW = 1680 (pad to 1792)
        ((B, 1, 6, 20, 32), 4096),      # THW = 3840 -> R=30, TR=8, nk=4
    ]
    for shape, tgt in cases:
        k_attn, sub = jax.random.split(k_attn)
        attn_map = jax.random.normal(sub, shape, jnp.float32)

        out = late_fusion_block(main_feat, attn_map, w1, b1, w2, b2, alpha,
                                tile_bytes_target=tgt)
        out = jax.block_until_ready(out)

        ref = ref_fn(main_feat, attn_map)
        assert out.shape == (B, out_dim)
        assert jnp.allclose(out, ref, atol=2e-5, rtol=1e-4), (
            f"mismatch for attn shape {shape}: "
            f"max abs err {float(jnp.max(jnp.abs(out - ref)))}")

    print("KERNEL_OK")
</pallas_src>

<mosaic_0001>
module attributes {stable_mosaic.version = 11 : i64} {
  func.func @_late_fusion_kernel(%arg0: i32, %arg1: i32, %arg2: memref<1x1x32xf32, #tpu.memory_space<vmem>>, %arg3: memref<1x16x128xf32, #tpu.memory_space<vmem>>, %arg4: memref<1x32xf32, #tpu.memory_space<vmem>>, %arg5: memref<1x32xf32, #tpu.memory_space<vmem>>, %arg6: memref<32x32xf32, #tpu.memory_space<vmem>>, %arg7: memref<1x32xf32, #tpu.memory_space<vmem>>, %arg8: memref<1xf32, #tpu.memory_space<smem>>, %arg9: memref<1x1x32xf32, #tpu.memory_space<vmem>>, %arg10: memref<8x128xf32, #tpu.memory_space<vmem>>) attributes {dimension_semantics = [#tpu.dimension_semantics<parallel>, #tpu.dimension_semantics<arbitrary>], iteration_bounds = array<i64: 2, 1>, scalar_prefetch = 0 : i64, scratch_operands = 1 : i64, tpu.core_type = #tpu.core_type<tc>, window_params = [{transform_indices = @transform_0, window_bounds = array<i64: 1, 1, 32>}, {transform_indices = @transform_1, window_bounds = array<i64: 1, 16, 128>}, {pipeline_mode = #tpu.pipeline_mode<synchronous>, transform_indices = @transform_2, window_bounds = array<i64: 1, 32>}, {pipeline_mode = #tpu.pipeline_mode<synchronous>, transform_indices = @transform_3, window_bounds = array<i64: 1, 32>}, {pipeline_mode = #tpu.pipeline_mode<synchronous>, transform_indices = @transform_4, window_bounds = array<i64: 32, 32>}, {pipeline_mode = #tpu.pipeline_mode<synchronous>, transform_indices = @transform_5, window_bounds = array<i64: 1, 32>}, {transform_indices = @transform_6, window_bounds = array<i64: 1>}, {transform_indices = @transform_7, window_bounds = array<i64: 1, 1, 32>}]} {
    %c0_i32 = arith.constant 0 : i32
    %0 = arith.cmpi eq, %arg1, %c0_i32 : i32
    %1 = arith.extui %0 : i1 to i32
    %c0_i32_0 = arith.constant 0 : i32
    %2 = arith.cmpi ne, %1, %c0_i32_0 : i32
    scf.if %2 {
      %cst_9 = arith.constant 0.000000e+00 : f32
      %13 = vector.broadcast %cst_9 : f32 to vector<8x128xf32>
      %c0_10 = arith.constant 0 : index
      %c0_11 = arith.constant 0 : index
      %14 = vector.load %arg10[%c0_10, %c0_11] : memref<8x128xf32, #tpu.memory_space<vmem>>, vector<8x128xf32>
      tpu.vector_store %arg10[%c0_10, %c0_11], %13 {strides = array<i32>} : memref<8x128xf32, #tpu.memory_space<vmem>>, vector<8x128xf32>,
    } else {
    }
    %c0 = arith.constant 0 : index
    %c0_1 = arith.constant 0 : index
    %c0_2 = arith.constant 0 : index
    %3 = vector.load %arg3[%c0, %c0_1, %c0_2] : memref<1x16x128xf32, #tpu.memory_space<vmem>>, vector<1x16x128xf32>
    %4 = vector.shape_cast %3 : vector<1x16x128xf32> to vector<16x128xf32>
    %5 = vector.shape_cast %4 : vector<16x128xf32> to vector<2x8x128xf32>
    %cst = arith.constant dense<0.000000e+00> : vector<8x128xf32>
    %6 = vector.multi_reduction <add>, %5, %cst [0] : vector<2x8x128xf32> to vector<8x128xf32>
    %c0_3 = arith.constant 0 : index
    %c0_4 = arith.constant 0 : index
    %7 = vector.load %arg10[%c0_3, %c0_4] : memref<8x128xf32, #tpu.memory_space<vmem>>, vector<8x128xf32>
    %8 = arith.addf %7, %6 : vector<8x128xf32>
    %c0_5 = arith.constant 0 : index
    %c0_6 = arith.constant 0 : index
    %9 = vector.load %arg10[%c0_5, %c0_6] : memref<8x128xf32, #tpu.memory_space<vmem>>, vector<8x128xf32>
    tpu.vector_store %arg10[%c0_5, %c0_6], %8 {strides = array<i32>} : memref<8x128xf32, #tpu.memory_space<vmem>>, vector<8x128xf32>,
    %c0_i32_7 = arith.constant 0 : i32
    %10 = arith.cmpi eq, %arg1, %c0_i32_7 : i32
    %11 = arith.extui %10 : i1 to i32
    %c0_i32_8 = arith.constant 0 : i32
    %12 = arith.cmpi ne, %11, %c0_i32_8 : i32
    scf.if %12 {
      %c0_9 = arith.constant 0 : index
      %c0_10 = arith.constant 0 : index
      %13 = vector.load %arg10[%c0_9, %c0_10] : memref<8x128xf32, #tpu.memory_space<vmem>>, vector<8x128xf32>
      %cst_11 = arith.constant dense<0.000000e+00> : vector<128xf32>
      %14 = vector.multi_reduction <add>, %13, %cst_11 [0] : vector<8x128xf32> to vector<128xf32>
      %15 = vector.shape_cast %14 : vector<128xf32> to vector<1x128xf32>
      %cst_12 = arith.constant dense<0.000000e+00> : vector<1xf32>
      %16 = vector.multi_reduction <add>, %15, %cst_12 [1] : vector<1x128xf32> to vector<1xf32>
      %17 = vector.shape_cast %16 : vector<1xf32> to vector<1x1xf32>
      %cst_13 = arith.constant 4.8828125E-4 : f32
      %18 = vector.broadcast %cst_13 : f32 to vector<1x1xf32>
      %19 = arith.mulf %17, %18 : vector<1x1xf32>
      %c0_14 = arith.constant 0 : index
      %c0_15 = arith.constant 0 : index
      %20 = vector.load %arg4[%c0_14, %c0_15] : memref<1x32xf32, #tpu.memory_space<vmem>>, vector<1x32xf32>
      %21 = vector.broadcast %19 : vector<1x1xf32> to vector<1x32xf32>
      %22 = arith.mulf %21, %20 : vector<1x32xf32>
      %c0_16 = arith.constant 0 : index
      %c0_17 = arith.constant 0 : index
      %23 = vector.load %arg5[%c0_16, %c0_17] : memref<1x32xf32, #tpu.memory_space<vmem>>, vector<1x32xf32>
      %24 = arith.addf %22, %23 : vector<1x32xf32>
      %cst_18 = arith.constant 0.000000e+00 : f32
      %25 = vector.broadcast %cst_18 : f32 to vector<1x32xf32>
      %26 = arith.maximumf %24, %25 : vector<1x32xf32>
      %c0_19 = arith.constant 0 : index
      %c0_20 = arith.constant 0 : index
      %27 = vector.load %arg6[%c0_19, %c0_20] : memref<32x32xf32, #tpu.memory_space<vmem>>, vector<32x32xf32>
      %cst_21 = arith.constant dense<0.000000e+00> : vector<1x32xf32>
      %28 = tpu.matmul %26, %27, %cst_21 {dimension_numbers = #tpu.dot_dimension_numbers<[1], [0], [0], [1], [0, 0, 1, 1], [], []>} : vector<1x32xf32>, vector<32x32xf32>, vector<1x32xf32> -> vector<1x32xf32>
      %c0_22 = arith.constant 0 : index
      %c0_23 = arith.constant 0 : index
      %29 = vector.load %arg7[%c0_22, %c0_23] : memref<1x32xf32, #tpu.memory_space<vmem>>, vector<1x32xf32>
      %30 = arith.addf %28, %29 : vector<1x32xf32>
      %c0_24 = arith.constant 0 : index
      %31 = memref.load %arg8[%c0_24] : memref<1xf32, #tpu.memory_space<smem>>
      %c0_25 = arith.constant 0 : index
      %c0_26 = arith.constant 0 : index
      %c0_27 = arith.constant 0 : index
      %32 = vector.load %arg2[%c0_25, %c0_26, %c0_27] : memref<1x1x32xf32, #tpu.memory_space<vmem>>, vector<1x1x32xf32>
      %33 = vector.shape_cast %32 : vector<1x1x32xf32> to vector<1x32xf32>
      %34 = vector.broadcast %31 : f32 to vector<1x32xf32>
      %35 = arith.mulf %34, %33 : vector<1x32xf32>
      %cst_28 = arith.constant 1.000000e+00 : f32
      %36 = arith.subf %cst_28, %31 : f32
      %37 = vector.broadcast %36 : f32 to vector<1x32xf32>
      %38 = arith.mulf %37, %30 : vector<1x32xf32>
      %39 = arith.addf %35, %38 : vector<1x32xf32>
      %c0_29 = arith.constant 0 : index
      %c0_30 = arith.constant 0 : index
      %c0_31 = arith.constant 0 : index
      %40 = vector.load %arg9[%c0_29, %c0_30, %c0_31] : memref<1x1x32xf32, #tpu.memory_space<vmem>>, vector<1x1x32xf32>
      %41 = vector.shape_cast %40 : vector<1x1x32xf32> to vector<1x32xf32>
      %42 = vector.shape_cast %39 : vector<1x32xf32> to vector<1x1x32xf32>
      tpu.vector_store %arg9[%c0_29, %c0_30, %c0_31], %42 {strides = array<i32>} : memref<1x1x32xf32, #tpu.memory_space<vmem>>, vector<1x1x32xf32>,
    } else {
    }
    return
  }
  func.func @transform_0(%arg0: i32, %arg1: i32) -> (i32, i32, i32) {
    %c0_i32 = arith.constant 0 : i32
    %c0_i32_0 = arith.constant 0 : i32
    %c0_i32_1 = arith.constant 0 : i32
    return %arg0, %c0_i32, %c0_i32_0 : i32, i32, i32
  }
  func.func @transform_1(%arg0: i32, %arg1: i32) -> (i32, i32, i32) {
    %c0_i32 = arith.constant 0 : i32
    %c0_i32_0 = arith.constant 0 : i32
    return %arg0, %arg1, %c0_i32 : i32, i32, i32
  }
  func.func @transform_2(%arg0: i32, %arg1: i32) -> (i32, i32) {
    %c0_i32 = arith.constant 0 : i32
    %c0_i32_0 = arith.constant 0 : i32
    %c0_i32_1 = arith.constant 0 : i32
    return %c0_i32, %c0_i32_0 : i32, i32
  }
  func.func @transform_3(%arg0: i32, %arg1: i32) -> (i32, i32) {
    %c0_i32 = arith.constant 0 : i32
    %c0_i32_0 = arith.constant 0 : i32
    %c0_i32_1 = arith.constant 0 : i32
    return %c0_i32, %c0_i32_0 : i32, i32
  }
  func.func @transform_4(%arg0: i32, %arg1: i32) -> (i32, i32) {
    %c0_i32 = arith.constant 0 : i32
    %c0_i32_0 = arith.constant 0 : i32
    %c0_i32_1 = arith.constant 0 : i32
    return %c0_i32, %c0_i32_0 : i32, i32
  }
  func.func @transform_5(%arg0: i32, %arg1: i32) -> (i32, i32) {
    %c0_i32 = arith.constant 0 : i32
    %c0_i32_0 = arith.constant 0 : i32
    %c0_i32_1 = arith.constant 0 : i32
    return %c0_i32, %c0_i32_0 : i32, i32
  }
  func.func @transform_6(%arg0: i32, %arg1: i32) -> i32 {
    %c0_i32 = arith.constant 0 : i32
    %c0_i32_0 = arith.constant 0 : i32
    return %c0_i32 : i32
  }
  func.func @transform_7(%arg0: i32, %arg1: i32) -> (i32, i32, i32) {
    %c0_i32 = arith.constant 0 : i32
    %c0_i32_0 = arith.constant 0 : i32
    %c0_i32_1 = arith.constant 0 : i32
    return %arg0, %c0_i32, %c0_i32_0 : i32, i32, i32
  }
}

</mosaic_0001>

<bundles_post_ra>
// kernel: tpu_custom_call.1
= control target key start
LH: loop header
LB: loop body
LE: loop exit
PB: predicated region body
PF: predicated region fallthrough
CT: control target
= control target key end

     0   :  { %s1121_s0 = inlined_call_operand.vmem [shape: f32[2,1,32], index: 0, kind: input, shape index: {}]   ;;  %s1122_s1 = inlined_call_operand.hbm [shape: f32[2,16,128], index: 1, kind: input, shape index: {}]   ;;  %s1123_s2 = inlined_call_operand.vmem [shape: f32[1,32], index: 2, kind: input, shape index: {}]   ;;  %s1124_s3 = inlined_call_operand.vmem [shape: f32[1,32], index: 3, kind: input, shape index: {}]   ;;  %s1125_s4 = inlined_call_operand.hbm [shape: f32[32,32], index: 4, kind: input, shape index: {}]   ;;  %s1126_s5 = inlined_call_operand.vmem [shape: f32[1,32], index: 5, kind: input, shape index: {}]   ;;  %s1127_s6 = inlined_call_operand.<no memory space> [shape: f32[1], index: 6, kind: input, shape index: {}]   ;;  %s1128_s7 = inlined_call_operand.hbm [shape: f32[2,1,32], index: 7, kind: output, shape index: {}]  }
   0x1   :  { %12 = sst [smem:[#allocation3]] %s1127_s6 }
   0x2   :  { %13 = vsyncpa [#allocation5], 0 }
   0x3   :  { %15 = vsyncpa [#allocation5 + $0x1], 0 }
   0x4   :  { %16 = vsyncpa [#allocation8], 0 }
   0x5   :  { %17 = vsyncpa [#allocation6], 0 }
   0x6   :  { %19 = vsyncpa [#allocation6 + $0x1], 0  ;;  %s883_s26 = smov 0   ;;  %s885_s27 = smov 0  }
   0x7   :  { %s887_s28 = smov 0   ;;  %s889_s29 = smov 0  }
   0x8   :  { %s891_s30 = smov 0   ;;  %s893_s8 = smov 0  }
   0x9 LB: > { %s570_s6 = sadd.s32 4294967295, %s830_s8   ;;  %s571_s9 = sadd.s32 4294967294, %s830_s8   ;;  %s830_s8 = sphi %s893_s8, %s25_s8   ;;  %s826_s30 = sphi %s891_s30, %s1156_s30   ;;  %s822_s29 = sphi %s889_s29, %s1155_s29   ;;  %s818_s28 = sphi %s887_s28, %s1154_s28   ;;  %s814_s27 = sphi %s885_s27, %s1153_s27   ;;  %s810_s26 = sphi %s883_s26, %s1152_s26  }
   0xa   : > { %p85_p0 = scmp.ne.s32.totalorder %s814_s27, %s810_s26  ;;  %p917_p1 = scmp.eq.s32.totalorder %s570_s6, 0 }
   0xb   : > { %p921_p2 = scmp.eq.s32.totalorder %s570_s6, 1  ;;  %p220_p3 = scmp.eq.s32.totalorder %s571_s9, 1 }
   0xc   : > { %s1135_s10 = scalar_select %p917_p1, 1, 0 }
   0xd   : > { %s1136_s11 = scalar_select %p921_p2, 1, 0 }
   0xe   : > { %p927_p4 = por %p917_p1, %p85_p0  ;;  %p572_p5 = scmp.ge.s32.totalorder %s830_s8, 1 }
   0xf   : > { %p932_p6 = por %p220_p3, %p85_p0  ;;  %p227_p7 = scmp.lt.s32.totalorder %s830_s8, 3 }
  0x10   : > { %s1137_s12 = scalar_select %p927_p4, 1, 0 }
  0x11   : > { %s1138_s13 = scalar_select %p932_p6, 1, 0 }
  0x12   : > { %p937_p8 = pnand %p572_p5, %p227_p7  ;;  %s832_s15 = smov [#allocation7]  }
  0x13   : > { %s245_s16 = sshll.u32 %s832_s15, 4  ;;  %s37_s18 = sadd.s32 1, %s826_s30  ;;  %s246_s16 = int_to_ptr.vmem [resolvable:$true] %s245_s16 }
  0x14   : > { %s1139_s14 = scalar_select %p937_p8, 1, 0 }
  0x15   : > { %p616_p9 = pneg %p937_p8  ;;  %s686_s21 = scalar_lea.hbm %s1125_s4, 512 }
  0x16   : > { %p687_p12 = scmp.ne.s32.totalorder %s1125_s4, %s686_s21  ;;  %p693_p5 = scmp.lt.u32.totalorder %s686_s21, %s1125_s4 }
  0x17   : > { %p946_p11 = pnand %p616_p9, %p917_p1 }
  0x19   : > { %p688_p13 = pneg %p946_p11 }
  0x1b   : > { %p689_p0 = pnand %p688_p13, %p687_p12 }
  0x1d   : > { %p690_p3 = pneg %p689_p0 }
  0x1f   : > { %p695_p7 = pnand %p693_p5, %p690_p3 }
  0x21   : > { %698 = shalt.err (!%p695_p7)
}
  0x22   : > { %s699_s6 = scalar_lea.vmem %s246_s16, 512  ;;  %p707_p1 = scmp.lt.s32.totalorder %s246_s16, %s246_s16 }
  0x23   : > { %p700_p9 = scmp.ne.s32.totalorder %s246_s16, %s699_s6  ;;  %p708_p4 = scmp.lt.s32.totalorder %s699_s6, %s699_s6 }
  0x25   : > { %p702_p10 = pnand %p700_p9, %p688_p13  ;;  %p709_p8 = por %p708_p4, %p707_p1 }
  0x27   : > { %p703_p6 = pneg %p702_p10 }
  0x29   : > { %p710_p2 = pnand %p709_p8, %p703_p6 }
  0x2b   : > { %713 = shalt.err (!%p710_p2)
}
  0x2c   : > { %s1133_s9 = smov 128   ;;  %s1134_s15 = smov 8  }
  0x2d   : > { %619 = dma.hbm_to_vmem [thread:$0]  (!%p946_p11), %s1125_s4, 512, %s246_s16, [#allocation8], %s1133_s9, %s1133_s9, %s1134_s15  }
  0x2e   : > { %p39_p1 = scmp.ge.s32.totalorder %s37_s18, 2  ;;  %s72_s21 = sadd.s32 1, %s818_s28 }
  0x2f   : > { %p79_p2 = scmp.ne.s32.totalorder %s818_s28, %s814_s27  ;;  %p80_p4 = scmp.eq.s32.totalorder %s830_s8, 0 }
  0x30   : > { %s1158_s18 = smov (%p39_p1, %s37_s18), 0  ;;  %p1142_p8 = scmp.ne.s32.totalorder %s1136_s11, 0 }
  0x31   : > { %p976_p6 = por %p80_p4, %p79_p2  ;;  %s67_s23 = ssub.s32 %s826_s30, %s1158_s18 }
  0x32   : > { %p982_p10 = por %p1142_p8, %p79_p2  ;;  %p629_p12 = scmp.lt.s32.totalorder %s830_s8, 2 }
  0x33   : > { %p70_p11 = scmp.eq.s32.totalorder %s67_s23, 0  ;;  %s271_s16 = sand.u32 1, %s818_s28  }
  0x34   : > { %s575_s24 = sshll.u32 %s271_s16, 4  ;;  %s585_s6 = sshll.u32 %s826_s30, 8 }
  0x35   : > { %s991_s25 = scalar_select %p70_p11, %s818_s28, %s72_s21  }
  0x36   : > { %s997_s9 = scalar_lea.hbm %s1122_s1, %s585_s6  ;;  %s275_s11 = scalar_lea.vmem [#allocation4], %s575_s24 }
  0x37   : > { %s284_s15 = sshll.u32 %s275_s11, 4  ;;  %p1003_p13 = pnand %p629_p12, %p976_p6  ;;  %s999_s15 = int_to_ptr.vmem [resolvable:$true] %s284_s15 }
  0x38   : > { %s1007_s21 = scalar_lea.sflag [#allocation5], %s271_s16  ;;  %s714_s19 = scalar_lea.hbm %s997_s9, 256 }
  0x39   : > { %p715_p0 = scmp.ne.s32.totalorder %s997_s9, %s714_s19  ;;  %p716_p3 = pneg %p1003_p13 }
  0x3a   : > { %s719_s22 = scalar_lea.hbm %s1122_s1, 512  ;;  %p720_p9 = scmp.lt.u32.totalorder %s997_s9, %s1122_s1 }
  0x3b   : > { %p717_p5 = pnand %p716_p3, %p715_p0  ;;  %p721_p1 = scmp.lt.u32.totalorder %s719_s22, %s714_s19 }
  0x3c   : > { %p723_p4 = scmp.lt.u32.totalorder %s714_s19, %s997_s9 }
  0x3d   : > { %p718_p7 = pneg %p717_p5  ;;  %p722_p2 = por %p721_p1, %p720_p9 }
  0x3f   : > { %p724_p6 = por %p723_p4, %p722_p2 }
  0x41   : > { %p725_p8 = pnand %p724_p6, %p718_p7 }
  0x43   : > { %728 = shalt.err (!%p725_p8)
}
  0x44   : > { %s729_s16 = scalar_lea.vmem %s999_s15, 256  ;;  %s835_s24 = smov [#allocation4]  }
  0x45   : > { %p730_p12 = scmp.ne.s32.totalorder %s999_s15, %s729_s16  ;;  %s734_s6 = sshll.u32 %s835_s24, 4  ;;  %s735_s6 = int_to_ptr.vmem [resolvable:$false] %s734_s6 }
  0x46   : > { %s736_s20 = scalar_lea.vmem %s735_s6, 512  ;;  %p737_p5 = scmp.lt.s32.totalorder %s999_s15, %s735_s6 }
  0x47   : > { %p732_p11 = pnand %p730_p12, %p716_p3  ;;  %p738_p9 = scmp.lt.s32.totalorder %s736_s20, %s729_s16 }
  0x49   : > { %p733_p0 = pneg %p732_p11  ;;  %p739_p1 = por %p738_p9, %p737_p5 }
  0x4b   : > { %p740_p2 = pnand %p739_p1, %p733_p0 }
  0x4d   : > { %743 = shalt.err (!%p740_p2)
}
  0x4e   : > { %s1145_s19 = smov 8   ;;  %s1146_s22 = smov 128  }
  0x4f   : > { %623 = dma.hbm_to_vmem [thread:$0]  (!%p1003_p13), %s997_s9, 256, %s999_s15, %s1007_s21, %s1146_s22, %s1146_s22, %s1145_s19  }
  0x50   : > { %p1147_p3 = scmp.ne.s32.totalorder %s1139_s14, 0 }
  0x51   : > { %s1041_s11 = sand.u32 (!%p1147_p3), 1, %s814_s27   ;;  %p1148_p7 = scmp.ne.s32.totalorder (!%p1147_p3), %s1137_s12, 0 }
  0x52   : > { %296 = sbr.rel (%p1147_p3) target bundleno = 490 (0x1ea), region = 48  ;;  %s579_s16 = sshll.u32 (!%p1147_p3), %s1041_s11, 4 }
  0x53   : > { %s299_s24 = scalar_lea.sflag (!%p1147_p3), [#allocation5], %s1041_s11  ;;  %s302_s6 = scalar_lea.vmem (!%p1147_p3), [#allocation4], %s579_s16 }
  0x59   : > { %797 = dma.done.wait (%p1148_p7), %s299_s24, 256  }
  0x5a   : > { %799 = vsyncadd (%p1148_p7), %s299_s24, 4294967040  ;;  %p1149_p4 = scmp.ne.s32.totalorder %s1135_s10, 0 }
  0x5c   : > { %801 = dma.done.wait (%p1149_p4), [#allocation8], 512  }
  0x5d   : > { %803 = vsyncadd (%p1149_p4), [#allocation8], 4294966784  ;;  %v348_v0 = vld [vmem:[%s302_s6] sm:$0xff]  ;;  %v349_v1 = vld [vmem:[%s302_s6 + $0x8] sm:$0xff]  ;;  %v836_v12 = vmov 0.0|0.0   ;;  %vm837_vm0 = vmmov 0  }
  0x5e   : > { %v350_v2 = vadd.f32 %v349_v1, %v348_v0  ;;  %v372_v9 = vld [vmem:[#allocation7] sm:$0xff]  ;;  %v373_v10 = vld [vmem:[#allocation7 + $0x8] sm:$0xff]  ;;  %602 = vmatprep.subr.bf16.mxu0 %v836_v12  ;;  %v374_v13 = vld [vmem:[#allocation7 + $0x10] sm:$0xff]  ;;  %v838_v16 = vmov 0.0   ;;  %vm377_vm1 = vcmask 261120   ;;  %p339_p13 = scmp.lt.s32.totalorder %s822_s29, 1 }
  0x5f   : > { %v603_v11 = vpack.c.bf16 %v373_v10, %v372_v9  ;;  %v375_v14 = vld [vmem:[#allocation7 + $0x18] sm:$0xff]  ;;  %599 = vmatprep.mubr.msk.f32.mxu0 %vm837_vm0, %v838_v16  ;;  %v367_v18 = vld [vmem:[%s1123_s2] sm:$0x1]  ;;  %s451_s15 = sld [smem:[#allocation3]]  ;;  %s582_s6 = sshll.u32 %s822_s29, 4  ;;  %vm459_vm2 = vcmask 253952  }
  0x60   : > { %v358_v3 = vrot.slane %v350_v2, 4  ;;  %v606_v15 = vpack.c.bf16 %v375_v14, %v374_v13  ;;  %v369_v20 = vld [vmem:[%s1124_s3] sm:$0x1]  ;;  %s340_s23 = scalar_select %p339_p13, %s822_s29, 1 }
  0x61   : > { %604 = vmatpush3.bf16.msra.mxu0 %v603_v11  ;;  %v376_v24 = vld [vmem:[%s1126_s5] sm:$0x1]  ;;  %s338_s10 = scalar_lea.vmem [#allocation9], %s1041_s11  ;;  %s839_s29 = smov [#allocation9]  }
  0x62   : > { %v359_v4 = vadd.f32 %v358_v3, %v350_v2  ;;  %605 = vmatprep.subr.bf16.mxu0 %v836_v12  ;;  %s341_s19 = scalar_lea.vmem %s1121_s0, %s340_s23  ;;  %s474_s12 = sshll.u32 %s338_s10, 4  ;;  %s1074_s12 = int_to_ptr.vmem [resolvable:$true] %s474_s12 }
  0x63   : > { %v452_v25 = vld [vmem:[%s341_s19] sm:$0x1]  ;;  %s1072_s23 = scalar_lea.hbm %s1128_s7, %s582_s6  ;;  %s744_s21 = scalar_lea.vmem %s1074_s12, 16 }
  0x64   : > { %v360_v5 = vrot.slane %v359_v4, 2  ;;  %p745_p6 = scmp.ne.s32.totalorder %s1074_s12, %s744_s21  ;;  %s748_s20 = sshll.u32 %s839_s29, 4  ;;  %s749_s20 = int_to_ptr.vmem [resolvable:$false] %s748_s20 }
  0x65   : > { %607 = vmatpush3.bf16.msra.mxu0 %v606_v15  ;;  %s455_s22 = ssub.f32 1.0, %s451_s15  ;;  %v453_v26 = vstv %s451_s15  ;;  %s462_s15 = scalar_lea.sflag [#allocation6], %s1041_s11 }
  0x66   : > { %v361_v6 = vadd.f32 %v360_v5, %v359_v4  ;;  %v454_v30 = vmul.f32 %v453_v26, %v452_v25  ;;  %p746_p8 = pnand %p745_p6, %p982_p10  ;;  %s750_s19 = scalar_lea.vmem %s749_s20, 32 }
  0x67   : > { %v456_v28 = vstv %s455_s22  ;;  %p751_p11 = scmp.lt.s32.totalorder %s1074_s12, %s749_s20  ;;  %p752_p0 = scmp.lt.s32.totalorder %s750_s19, %s744_s21 }
  0x68   : > { %v362_v7 = vrot.slane %v361_v6, 1  ;;  %p747_p12 = pneg %p746_p8 }
  0x69   : > { %p753_p5 = por %p752_p0, %p751_p11 }
  0x6a   : > { %v363_v8 = vadd.f32 %v362_v7, %v361_v6 }
  0x6b   : > { %p754_p9 = pnand %p753_p5, %p747_p12 }
  0x6c   : > { %364 = vadd.xlane.f32.xlu0 %v363_v8 }
  0xf9   : > { %v365_v17 = vpop.xlane.xlu0 %364 }
  0xfa   : > { %v366_v19 = vmul.f32 0.00048828125, %v365_v17 }
  0xfc   : > { %v368_v21 = vmul.f32 %v367_v18, %v366_v19 }
  0xfe   : > { %v370_v22 = vadd.f32 %v369_v20, %v368_v21 }
 0x100   : > { %v371_v23 = vmax.f32 %v370_v22, 0.0 }
 0x102   : > { %600 = vmatmul.mubr.msk.f32.vlgmr.msra.gmra.mrb[0].mxu0 %vm377_vm1, %v371_v23 }
 0x1d5   : > { %v447_v27 = vpop.f32.mrb[0].mxu0 }
 0x1d6   : > { %v448_v29 = vadd.f32 %v447_v27, %v376_v24  ;;  %v601_v31 = vpop.f32.mrb[1].mxu0 }
 0x1d8   : > { %v457_v32 = vmul.f32 %v456_v28, %v448_v29 }
 0x1da   : > { %v458_v33 = vadd.f32 %v457_v32, %v454_v30 }
 0x1dc   : > { %460 = vst.msk [vmem:[%s338_s10] sm:$0x1] %vm459_vm2, %v458_v33 }
 0x1dd   : > { %757 = shalt.err (!%p754_p9)
}
 0x1de   : > { %s758_s11 = scalar_lea.hbm %s1072_s23, 16  ;;  %s762_s24 = scalar_lea.hbm %s1128_s7, 32 }
 0x1df   : > { %p759_p1 = scmp.ne.s32.totalorder %s1072_s23, %s758_s11  ;;  %p763_p7 = scmp.lt.u32.totalorder %s1072_s23, %s1128_s7 }
 0x1e0   : > { %p764_p4 = scmp.lt.u32.totalorder %s762_s24, %s758_s11  ;;  %p766_p6 = scmp.lt.u32.totalorder %s758_s11, %s1072_s23 }
 0x1e1   : > { %p760_p2 = pnand %p759_p1, %p982_p10 }
 0x1e2   : > { %p765_p13 = por %p764_p4, %p763_p7 }
 0x1e3   : > { %p761_p3 = pneg %p760_p2 }
 0x1e4   : > { %p767_p8 = por %p766_p6, %p765_p13 }
 0x1e6   : > { %p768_p12 = pnand %p767_p8, %p761_p3 }
 0x1e8   : > { %771 = shalt.err (!%p768_p12)
}
 0x1e9   : > { %614 = dma.vmem_to_hbm [thread:$0]  (%p982_p10), %s1074_s12, 16, %s1072_s23, %s462_s15  }
 0x1ea PF: > { %s486_s14 = sand.u32 1, %s810_s26   ;;  %p1150_p11 = scmp.ne.s32.totalorder %s1138_s13, 0 }
 0x1eb   : > { %p1151_p0 = scmp.ge.s32.totalorder %s830_s8, 2  ;;  %s487_s9 = scalar_lea.sflag [#allocation6], %s486_s14 }
 0x1ed   : > { %p625_p5 = pnand %p1151_p0, %p1150_p11 }
 0x1ef   : > { %805 = dma.done.wait (!%p625_p5), %s487_s9, 16  }
 0x1f0   : > { %807 = vsyncadd (!%p625_p5), %s487_s9, 4294967280  ;;  %s25_s8 = sadd.s32 1, %s830_s8   ;;  %s1152_s26 = smov %s814_s27 }
 0x1f1   : > { %p22_p9 = scmp.ge.s32.totalorder %s25_s8, 4   ;;  %s1153_s27 = smov %s818_s28 }
 0x1f2   : > { %s1154_s28 = smov %s991_s25  ;;  %s1155_s29 = smov %s826_s30 }
 0x1f3   : > { %s1156_s30 = smov %s1158_s18  ;;  %24 = sbr.rel (!%p22_p9) target bundleno = 9 (0x9), region = 108 }
 0x1fa   :  { %491 = vsyncpa [#allocation5], 1 }
 0x1fb   :  { %493 = vsyncpa [#allocation5 + $0x1], 1 }
 0x1fc   :  { %494 = vsyncpa [#allocation8], 1 }
 0x1fd   :  { %495 = vsyncpa [#allocation6], 1 }
 0x1fe   :  { %497 = vsyncpa [#allocation6 + $0x1], 1 }

</bundles_post_ra>
